<compile_context>
chip_gen: v7x
topology: tpu7x:2x2x1
jax: 0.10.0
libtpu: 0.0.40
codegen_flags: <defaults>
</compile_context>

<pallas_src>
import jax
import jax.numpy as jnp
from jax.experimental import pallas as pl
from jax.experimental.pallas import tpu as pltpu


# ---------------------------------------------------------------------------
# Generic tiled GEMM + bias kernel (P1 pattern).  Used for:
#   - EncoderCNN embed Linear           (B, 2048) @ (2048, E)  + b_embed
#   - hoisted LSTM input projection     (T*Bp, E) @ (E, 4H)    + (b_ih + b_hh)
#   - hoisted output projection         (Bp*T, H) @ (H, V)     + b_lin
# ---------------------------------------------------------------------------
def _matmul_bias_kernel(a_ref, b_ref, bias_ref, o_ref, acc_ref):
    @pl.when(pl.program_id(2) == 0)
    def _():
        acc_ref[...] = jnp.zeros_like(acc_ref)

    acc_ref[...] += jnp.dot(a_ref[...], b_ref[...],
                            preferred_element_type=jnp.float32)

    @pl.when(pl.program_id(2) == pl.num_programs(2) - 1)
    def _():
        o_ref[...] = (acc_ref[...] + bias_ref[...]).astype(o_ref.dtype)


def _pick_tile(dim, candidates):
    for c in candidates:
        if c <= dim and dim % c == 0:
            return c
    return dim   # full extent is always a legal block size


def matmul_bias(a, b, bias, *, use_bf16=True, out_dtype=jnp.float32):
    """(M, K) @ (K, N) + bias(1, N); bf16 MXU operands, f32 accumulation."""
    M, K = a.shape
    K2, N = b.shape
    assert K == K2 and bias.shape == (1, N)
    if use_bf16:
        a = a.astype(jnp.bfloat16)
        b = b.astype(jnp.bfloat16)
    bias = bias.astype(jnp.float32)

    tm = _pick_tile(M, (256, 128, 64, 32, 16))
    tn = _pick_tile(N, (512, 256, 128))
    tk = _pick_tile(K, (512, 256, 128))
    grid = (M // tm, N // tn, K // tk)

    return pl.pallas_call(
        _matmul_bias_kernel,
        out_shape=jax.ShapeDtypeStruct((M, N), out_dtype),
        grid_spec=pltpu.PrefetchScalarGridSpec(
            num_scalar_prefetch=0,
            grid=grid,
            in_specs=[
                pl.BlockSpec((tm, tk), lambda i, j, k: (i, k)),
                pl.BlockSpec((tk, tn), lambda i, j, k: (k, j)),
                pl.BlockSpec((1, tn), lambda i, j, k: (0, j)),
            ],
            out_specs=pl.BlockSpec((tm, tn), lambda i, j, k: (i, j)),
            scratch_shapes=[pltpu.VMEM((tm, tn), jnp.float32)],
        ),
        compiler_params=pltpu.CompilerParams(
            dimension_semantics=("parallel", "parallel", "arbitrary")),
    )(a, b, bias)


# ---------------------------------------------------------------------------
# LSTM recurrence: one pallas_call, in-kernel fori_loop over T.
# gate_x_ref : (T, Bp, 4H) f32   precomputed x @ W_ih^T + b_ih + b_hh
# w_hh_ref   : (H, 4H)     f32
# hs_ref     : (T, Bp, H)  f32   hidden states (output)
# ---------------------------------------------------------------------------
def _lstm_recurrence_kernel(gate_x_ref, w_hh_ref, hs_ref):
    T, Bp, G = gate_x_ref.shape
    H = G // 4
    w_hh = w_hh_ref[...]          # load once, reused every step

    def step(t, carry):
        h, c = carry
        gates = gate_x_ref[t] + jnp.dot(h, w_hh,
                                        preferred_element_type=jnp.float32)
        i_g = jax.nn.sigmoid(gates[:, 0 * H:1 * H])
        f_g = jax.nn.sigmoid(gates[:, 1 * H:2 * H])
        g_g = jnp.tanh(gates[:, 2 * H:3 * H])
        o_g = jax.nn.sigmoid(gates[:, 3 * H:4 * H])
        c_new = f_g * c + i_g * g_g
        h_new = o_g * jnp.tanh(c_new)
        hs_ref[t] = h_new
        return (h_new, c_new)

    h0 = jnp.zeros((Bp, H), jnp.float32)
    c0 = jnp.zeros((Bp, H), jnp.float32)
    jax.lax.fori_loop(0, T, step, (h0, c0))


# ---------------------------------------------------------------------------
# Module forwards
# ---------------------------------------------------------------------------
def encoder_cnn_forward(resnet_pooled, params):
    """EncoderCNN.forward minus the frozen ResNet-50 backbone.

    resnet_pooled : (B, 2048) pooled backbone output (= resnet(images).view(B, -1))
    returns       : (B, E) embedded features
    """
    # TODO(synk): the frozen, pretrained ResNet-50 conv stack + avgpool is not
    # translated to Pallas (no pretrained weights available in-script).
    B = resnet_pooled.shape[0]
    feats = resnet_pooled.reshape(B, -1)
    return matmul_bias(feats, params["w_embed_t"], params["b_embed"])


def decoder_rnn_forward(features, captions, params):
    """DecoderRNN.forward: features (B, E), captions (B, L) -> logits (B, L, V)."""
    embed_w = params["embed_w"]      # (V, E)
    w_ih_t = params["w_ih_t"]        # (E, 4H)
    w_hh_t = params["w_hh_t"]        # (H, 4H)
    b_lstm = params["b_lstm"]        # (1, 4H) == b_ih + b_hh
    w_lin_t = params["w_lin_t"]      # (H, V)
    b_lin = params["b_lin"]          # (1, V)

    B, E = features.shape
    H = w_hh_t.shape[0]
    V = w_lin_t.shape[1]

    # glue: drop last token, embedding gather, prepend image features (XLA)
    cap = captions[:, :-1]                                    # (B, L-1)
    word_embeds = jnp.take(embed_w, cap, axis=0)              # (B, L-1, E)
    inputs = jnp.concatenate([features[:, None, :], word_embeds], axis=1)  # (B, T, E)
    T = inputs.shape[1]

    # sublane padding: batch -> multiple of 8 (unmasked vreg rows)
    B_pad = ((B + 7) // 8) * 8
    if B_pad != B:
        inputs = jnp.pad(inputs, ((0, B_pad - B), (0, 0), (0, 0)))
    inputs = inputs.astype(jnp.float32)

    # hoisted input projection + fused LSTM biases: one big GEMM
    x_tm = jnp.transpose(inputs, (1, 0, 2)).reshape(T * B_pad, E)   # E-wide (cheap)
    gate_x = matmul_bias(x_tm, w_ih_t, b_lstm).reshape(T, B_pad, 4 * H)

    # sequential recurrence: single kernel invocation, whole sequence in VMEM
    # TODO(synk): for very long T / large B, chunk T so gate_x/hs stay within VMEM.
    hs = pl.pallas_call(
        _lstm_recurrence_kernel,
        out_shape=jax.ShapeDtypeStruct((T, B_pad, H), jnp.float32),
        in_specs=[
            pl.BlockSpec(memory_space=pltpu.MemorySpace.VMEM),
            pl.BlockSpec(memory_space=pltpu.MemorySpace.VMEM),
        ],
        out_specs=pl.BlockSpec(memory_space=pltpu.MemorySpace.VMEM),
    )(gate_x, w_hh_t.astype(jnp.float32))

    # hoisted output projection: one big lane-dense GEMM, batch-major output
    hs_bt = jnp.transpose(hs, (1, 0, 2)).reshape(B_pad * T, H)      # H-wide (cheap)
    logits = matmul_bias(hs_bt, w_lin_t, b_lin).reshape(B_pad, T, V)
    return logits[:B]                                               # (B, L, V)


# ---------------------------------------------------------------------------
# Parameter init mirroring the PyTorch modules (deterministic)
# ---------------------------------------------------------------------------
def init_params(key, embed_size, hidden_size, vocab_size, resnet_feat):
    kE, k1, k2, k3, k4, k5, k6, k7 = jax.random.split(key, 8)
    E, H, V, F = embed_size, hidden_size, vocab_size, resnet_feat

    # nn.Embedding default: N(0, 1)
    embed_w = jax.random.normal(kE, (V, E), jnp.float32)

    # nn.LSTM default: U(-1/sqrt(H), 1/sqrt(H))
    k = 1.0 / jnp.sqrt(jnp.float32(H))
    w_ih = jax.random.uniform(k1, (4 * H, E), jnp.float32, -k, k)
    w_hh = jax.random.uniform(k2, (4 * H, H), jnp.float32, -k, k)
    b_ih = jax.random.uniform(k3, (4 * H,), jnp.float32, -k, k)
    b_hh = jax.random.uniform(k4, (4 * H,), jnp.float32, -k, k)
    b_ih = b_ih.at[H:2 * H].set(1.0)   # forget-gate bias init
    b_hh = b_hh.at[H:2 * H].set(1.0)

    # DecoderRNN linear: xavier_normal_ weight, bias = 0.01
    std = jnp.sqrt(2.0 / (H + V))
    w_lin = jax.random.normal(k5, (V, H), jnp.float32) * std
    b_lin = jnp.full((V,), 0.01, jnp.float32)

    # EncoderCNN.embed = nn.Linear(2048, E) default init
    kf = 1.0 / jnp.sqrt(jnp.float32(F))
    w_embed = jax.random.uniform(k6, (E, F), jnp.float32, -kf, kf)
    b_embed = jax.random.uniform(k7, (E,), jnp.float32, -kf, kf)

    return {
        "embed_w": embed_w,
        "w_ih_t": w_ih.T,                   # (E, 4H)
        "w_hh_t": w_hh.T,                   # (H, 4H)
        "b_lstm": (b_ih + b_hh)[None, :],   # (1, 4H)
        "w_lin_t": w_lin.T,                 # (H, V)
        "b_lin": b_lin[None, :],            # (1, V)
        "w_embed_t": w_embed.T,             # (2048, E)
        "b_embed": b_embed[None, :],        # (1, E)
    }


# ---------------------------------------------------------------------------
# Pure-JAX references (mirror the bf16 operand rounding of the GEMM kernels)
# ---------------------------------------------------------------------------
def _mm(a, b):
    return jnp.dot(a, b, precision=jax.lax.Precision.HIGHEST)


def _bf16_round(x):
    return x.astype(jnp.bfloat16).astype(jnp.float32)


def _reference_encoder(resnet_pooled, params):
    B = resnet_pooled.shape[0]
    feats = resnet_pooled.reshape(B, -1)
    return _mm(_bf16_round(feats), _bf16_round(params["w_embed_t"])) + params["b_embed"]


def _reference_decoder(features, captions, params):
    cap = captions[:, :-1]
    word_embeds = jnp.take(params["embed_w"], cap, axis=0)
    inputs = jnp.concatenate([features[:, None, :], word_embeds], axis=1)  # (B, T, E)
    B, T, E = inputs.shape
    H = params["w_hh_t"].shape[0]

    gate_x = (_mm(_bf16_round(inputs.reshape(B * T, E)),
                  _bf16_round(params["w_ih_t"])) + params["b_lstm"]).reshape(B, T, 4 * H)

    def step(carry, gx_t):
        h, c = carry
        gates = gx_t + _mm(h, params["w_hh_t"])
        i = jax.nn.sigmoid(gates[:, 0 * H:1 * H])
        f = jax.nn.sigmoid(gates[:, 1 * H:2 * H])
        g = jnp.tanh(gates[:, 2 * H:3 * H])
        o = jax.nn.sigmoid(gates[:, 3 * H:4 * H])
        c = f * c + i * g
        h = o * jnp.tanh(c)
        return (h, c), h

    h0 = jnp.zeros((B, H), jnp.float32)
    (_, _), hs = jax.lax.scan(step, (h0, h0), jnp.transpose(gate_x, (1, 0, 2)))
    hs_bt = jnp.transpose(hs, (1, 0, 2)).reshape(B * T, H)
    logits = _mm(_bf16_round(hs_bt), _bf16_round(params["w_lin_t"])) + params["b_lin"]
    return logits.reshape(B, T, -1)


if __name__ == "__main__":
    B, E, H, V, L = 2, 32, 32, 128, 8
    RESNET_FEAT = 2048   # resnet50 fc.in_features

    key = jax.random.PRNGKey(0)
    kp, kf, kc = jax.random.split(key, 3)

    params = init_params(kp, E, H, V, RESNET_FEAT)
    # Stand-in for the frozen ResNet-50 backbone's pooled output.
    resnet_pooled = jax.random.normal(kf, (B, RESNET_FEAT), jnp.float32)
    captions = jax.random.randint(kc, (B, L), 0, V, dtype=jnp.int32)

    features = encoder_cnn_forward(resnet_pooled, params)     # (B, E)
    out = decoder_rnn_forward(features, captions, params)     # (B, L, V)
    features, out = jax.block_until_ready((features, out))

    assert features.shape == (B, E), features.shape
    assert out.shape == (B, L, V), out.shape

    ref_feat = jax.block_until_ready(_reference_encoder(resnet_pooled, params))
    ref_out = jax.block_until_ready(_reference_decoder(features, captions, params))

    if not jnp.allclose(features, ref_feat, atol=2e-3, rtol=2e-3):
        raise AssertionError("encoder embed kernel does not match reference")
    if not jnp.allclose(out, ref_out, atol=5e-3, rtol=5e-3):
        raise AssertionError("decoder kernel does not match reference")

    print("KERNEL_OK")
</pallas_src>

<mosaic_0001>
module attributes {stable_mosaic.version = 11 : i64} {
  func.func @_matmul_bias_kernel(%arg0: i32, %arg1: i32, %arg2: i32, %arg3: memref<2x512xbf16, #tpu.memory_space<vmem>>, %arg4: memref<512x32xbf16, #tpu.memory_space<vmem>>, %arg5: memref<1x32xf32, #tpu.memory_space<vmem>>, %arg6: memref<2x32xf32, #tpu.memory_space<vmem>>, %arg7: memref<2x32xf32, #tpu.memory_space<vmem>>) attributes {dimension_semantics = [#tpu.dimension_semantics<parallel>, #tpu.dimension_semantics<parallel>, #tpu.dimension_semantics<arbitrary>], iteration_bounds = array<i64: 1, 1, 4>, scalar_prefetch = 0 : i64, scratch_operands = 1 : i64, tpu.core_type = #tpu.core_type<tc>, window_params = [{transform_indices = @transform_0, window_bounds = array<i64: 2, 512>}, {transform_indices = @transform_1, window_bounds = array<i64: 512, 32>}, {transform_indices = @transform_2, window_bounds = array<i64: 1, 32>}, {transform_indices = @transform_3, window_bounds = array<i64: 2, 32>}]} {
    %c0_i32 = arith.constant 0 : i32
    %0 = arith.cmpi eq, %arg2, %c0_i32 : i32
    %1 = arith.extui %0 : i1 to i32
    %c0_i32_0 = arith.constant 0 : i32
    %2 = arith.cmpi ne, %1, %c0_i32_0 : i32
    scf.if %2 {
      %cst_9 = arith.constant 0.000000e+00 : f32
      %12 = vector.broadcast %cst_9 : f32 to vector<2x32xf32>
      %c0_10 = arith.constant 0 : index
      %c0_11 = arith.constant 0 : index
      %13 = vector.load %arg7[%c0_10, %c0_11] : memref<2x32xf32, #tpu.memory_space<vmem>>, vector<2x32xf32>
      tpu.vector_store %arg7[%c0_10, %c0_11], %12 {strides = array<i32>} : memref<2x32xf32, #tpu.memory_space<vmem>>, vector<2x32xf32>,
    } else {
    }
    %c0 = arith.constant 0 : index
    %c0_1 = arith.constant 0 : index
    %3 = vector.load %arg7[%c0, %c0_1] : memref<2x32xf32, #tpu.memory_space<vmem>>, vector<2x32xf32>
    %c0_2 = arith.constant 0 : index
    %c0_3 = arith.constant 0 : index
    %4 = vector.load %arg3[%c0_2, %c0_3] : memref<2x512xbf16, #tpu.memory_space<vmem>>, vector<2x512xbf16>
    %c0_4 = arith.constant 0 : index
    %c0_5 = arith.constant 0 : index
    %5 = vector.load %arg4[%c0_4, %c0_5] : memref<512x32xbf16, #tpu.memory_space<vmem>>, vector<512x32xbf16>
    %cst = arith.constant dense<0.000000e+00> : vector<2x32xf32>
    %6 = tpu.matmul %4, %5, %cst {dimension_numbers = #tpu.dot_dimension_numbers<[1], [0], [0], [1], [0, 0, 1, 1], [], []>} : vector<2x512xbf16>, vector<512x32xbf16>, vector<2x32xf32> -> vector<2x32xf32>
    %7 = arith.addf %3, %6 : vector<2x32xf32>
    %c0_6 = arith.constant 0 : index
    %c0_7 = arith.constant 0 : index
    %8 = vector.load %arg7[%c0_6, %c0_7] : memref<2x32xf32, #tpu.memory_space<vmem>>, vector<2x32xf32>
    tpu.vector_store %arg7[%c0_6, %c0_7], %7 {strides = array<i32>} : memref<2x32xf32, #tpu.memory_space<vmem>>, vector<2x32xf32>,
    %c3_i32 = arith.constant 3 : i32
    %9 = arith.cmpi eq, %arg2, %c3_i32 : i32
    %10 = arith.extui %9 : i1 to i32
    %c0_i32_8 = arith.constant 0 : i32
    %11 = arith.cmpi ne, %10, %c0_i32_8 : i32
    scf.if %11 {
      %c0_9 = arith.constant 0 : index
      %c0_10 = arith.constant 0 : index
      %12 = vector.load %arg7[%c0_9, %c0_10] : memref<2x32xf32, #tpu.memory_space<vmem>>, vector<2x32xf32>
      %c0_11 = arith.constant 0 : index
      %c0_12 = arith.constant 0 : index
      %13 = vector.load %arg5[%c0_11, %c0_12] : memref<1x32xf32, #tpu.memory_space<vmem>>, vector<1x32xf32>
      %14 = vector.broadcast %13 : vector<1x32xf32> to vector<2x32xf32>
      %15 = arith.addf %12, %14 : vector<2x32xf32>
      %c0_13 = arith.constant 0 : index
      %c0_14 = arith.constant 0 : index
      %16 = vector.load %arg6[%c0_13, %c0_14] : memref<2x32xf32, #tpu.memory_space<vmem>>, vector<2x32xf32>
      tpu.vector_store %arg6[%c0_13, %c0_14], %15 {strides = array<i32>} : memref<2x32xf32, #tpu.memory_space<vmem>>, vector<2x32xf32>,
    } else {
    }
    return
  }
  func.func @transform_0(%arg0: i32, %arg1: i32, %arg2: i32) -> (i32, i32) {
    %c0_i32 = arith.constant 0 : i32
    return %arg0, %arg2 : i32, i32
  }
  func.func @transform_1(%arg0: i32, %arg1: i32, %arg2: i32) -> (i32, i32) {
    %c0_i32 = arith.constant 0 : i32
    return %arg2, %arg1 : i32, i32
  }
  func.func @transform_2(%arg0: i32, %arg1: i32, %arg2: i32) -> (i32, i32) {
    %c0_i32 = arith.constant 0 : i32
    %c0_i32_0 = arith.constant 0 : i32
    return %c0_i32, %arg1 : i32, i32
  }
  func.func @transform_3(%arg0: i32, %arg1: i32, %arg2: i32) -> (i32, i32) {
    %c0_i32 = arith.constant 0 : i32
    return %arg0, %arg1 : i32, i32
  }
}

</mosaic_0001>

<bundles_post_ra>
// kernel: tpu_custom_call.1
= control target key start
LH: loop header
LB: loop body
LE: loop exit
PB: predicated region body
PF: predicated region fallthrough
CT: control target
= control target key end

     0   :  { %8 = vsyncpa [#allocation4], 0  ;;  %s962_s12 = smov 0   ;;  %s964_s13 = smov 0   ;;  %s1075_s0 = inlined_call_operand.vmem [shape: bf16[2,2048], index: 0, kind: input, shape index: {}]   ;;  %s1076_s1 = inlined_call_operand.vmem [shape: bf16[2048,32], index: 1, kind: input, shape index: {}]   ;;  %s1077_s2 = inlined_call_operand.vmem [shape: f32[1,32], index: 2, kind: input, shape index: {}]   ;;  %s1078_s3 = inlined_call_operand.hbm [shape: f32[2,32], index: 3, kind: output, shape index: {}]  }
   0x1   :  { %s966_s14 = smov 0  }
   0x2 LB: > { %s728_s15 = sadd.s32 4294967295, %s937_s14   ;;  %s26_s16 = sadd.s32 1, %s933_s13  ;;  %s937_s14 = sphi %s966_s14, %s14_s14   ;;  %s933_s13 = sphi %s964_s13, %s1081_s13   ;;  %s929_s12 = sphi %s962_s12, %s1080_s12  }
   0x3   : > { %p27_p0 = scmp.ge.s32.totalorder %s26_s16, 4  ;;  %p732_p1 = scmp.ge.s32.totalorder %s937_s14, 1 }
   0x4   : > { %p189_p2 = scmp.lt.s32.totalorder %s937_s14, 5 }
   0x5   : > { %s1083_s16 = smov (%p27_p0, %s26_s16), 0 }
   0x6   : > { %p190_p3 = pnand %p732_p1, %p189_p2 }
   0x7   : > { %s733_s17 = sshll.u32 (!%p190_p3), %s929_s12, 2  ;;  %s734_s18 = sshll.u32 (!%p190_p3), %s929_s12, 6 }
   0x8   : > { %193 = sbr.rel (%p190_p3) target bundleno = 314 (0x13a), region = 32  ;;  %p225_p4 = scmp.lt.s32.totalorder (!%p190_p3), %s733_s17, 15 }
   0x9   : > { %p232_p5 = scmp.lt.s32.totalorder (!%p190_p3), %s734_s18, 255  ;;  %p736_p6 = scmp.ne.s32.totalorder (!%p190_p3), %s929_s12, 0 }
   0xf   : > { %s1085_s17 = smov (!%p225_p4, %s733_s17), 15  ;;  %s1087_s18 = smov (!%p232_p5, %s734_s18), 255 }
  0x10   : > { %s229_s21 = scalar_lea.vmem %s1075_s0, %s1085_s17  ;;  %s735_s22 = sshll.u32 %s1087_s18, 2  ;;  %vm248_vm0 = vcmask (!%p736_p6), 254976   ;;  %v939_v0 = vmov (!%p736_p6), 0.0  }
  0x11   : > { %s994_s25 = scalar_lea.vmem %s1076_s1, %s735_s22  ;;  %247 = sbr.rel (%p736_p6) target bundleno = 24 (0x18), region = 36  ;;  %249 = vst.msk [vmem:[#allocation2] sm:$0x3] (!%p736_p6), %vm248_vm0, %v939_v0 }
  0x18 PF: > { %v853_v1 = vld [vmem:[%s994_s25 + $0x40] sm:$0xff]   ;;  %v857_v5 = vld [vmem:[%s994_s25 + $0x48] sm:$0xff]   ;;  %v861_v9 = vld [vmem:[%s994_s25 + $0x50] sm:$0xff]   ;;  %v328_v31 = vlaneseq  ;;  %v940_v35 = vmov 1966171168   ;;  %vm618_vm1 = vcmask 254976  }
  0x19   : > { %v854_v2 = vld [vmem:[%s994_s25 + $0xc0] sm:$0xff]   ;;  %776 = vmatprep.subr.bf16.mxu0 %v853_v1  ;;  %v858_v6 = vld [vmem:[%s994_s25 + $0xc8] sm:$0xff]   ;;  %v862_v10 = vld [vmem:[%s994_s25 + $0xd0] sm:$0xff]   ;;  %v326_v36 = vunpack.c.l.s4 %v940_v35  ;;  %p770_p7 = scmp.ne.s32.totalorder %s929_s12, 3 }
  0x1a   : > { %v855_v3 = vld [vmem:[%s994_s25] sm:$0xff]   ;;  %798 = vmatprep.subr.bf16.mxu1 %v854_v2  ;;  %v859_v7 = vld [vmem:[%s994_s25 + $0x8] sm:$0xff]   ;;  %v863_v11 = vld [vmem:[%s994_s25 + $0x10] sm:$0xff]   ;;  %v329_v37 = vshrl.u32 %v328_v31, 7 }
  0x1b   : > { %v856_v4 = vld [vmem:[%s994_s25 + $0x80] sm:$0xff]   ;;  %777 = vmatpush3.bf16.msra.mxu0 %v855_v3  ;;  %v860_v8 = vld [vmem:[%s994_s25 + $0x88] sm:$0xff]   ;;  %v864_v12 = vld [vmem:[%s994_s25 + $0x90] sm:$0xff]   ;;  %v327_v39 = vunpack.c.0.s8 %v326_v36 }
  0x1c   : > { %799 = vmatpush3.bf16.msra.mxu1 %v856_v4  ;;  %778 = vmatprep.subr.bf16.mxu0 %v857_v5  ;;  %v865_v13 = vld [vmem:[%s994_s25 + $0x58] sm:$0xff]   ;;  %v869_v17 = vld [vmem:[%s994_s25 + $0x60] sm:$0xff]   ;;  %v873_v21 = vld [vmem:[%s994_s25 + $0x68] sm:$0xff]  }
  0x1d   : > { %800 = vmatprep.subr.bf16.mxu1 %v858_v6  ;;  %v866_v14 = vld [vmem:[%s994_s25 + $0xd8] sm:$0xff]   ;;  %v870_v18 = vld [vmem:[%s994_s25 + $0xe0] sm:$0xff]   ;;  %v874_v22 = vld [vmem:[%s994_s25 + $0xe8] sm:$0xff]   ;;  %v330_v40 = vsub.s32 %v327_v39, %v329_v37 }
  0x1e   : > { %v867_v15 = vld [vmem:[%s994_s25 + $0x18] sm:$0xff]   ;;  %v871_v19 = vld [vmem:[%s994_s25 + $0x20] sm:$0xff]   ;;  %v875_v23 = vld [vmem:[%s994_s25 + $0x28] sm:$0xff]  }
  0x1f   : > { %779 = vmatpush3.bf16.msra.mxu0 %v859_v7  ;;  %v868_v16 = vld [vmem:[%s994_s25 + $0x98] sm:$0xff]   ;;  %v872_v20 = vld [vmem:[%s994_s25 + $0xa0] sm:$0xff]   ;;  %v876_v24 = vld [vmem:[%s994_s25 + $0xa8] sm:$0xff]  }
  0x20   : > { %801 = vmatpush3.bf16.msra.mxu1 %v860_v8  ;;  %780 = vmatprep.subr.bf16.mxu0 %v861_v9  ;;  %v877_v25 = vld [vmem:[%s994_s25 + $0x70] sm:$0xff]   ;;  %v881_v29 = vld [vmem:[%s994_s25 + $0x78] sm:$0xff]   ;;  %v737_v34 = vld.sshfl [vmem:[%s229_s21] sm:$0x33 pattern:$0x75316420] }
  0x21   : > { %802 = vmatprep.subr.bf16.mxu1 %v862_v10  ;;  %v878_v26 = vld [vmem:[%s994_s25 + $0xf0] sm:$0xff]   ;;  %v882_v30 = vld [vmem:[%s994_s25 + $0xf8] sm:$0xff]   ;;  %v324_v38 = vcombine.high %v737_v34, %v737_v34  ;;  %v331_v42 = vrot.slane %v737_v34, %v330_v40  ;;  %v250_v54 = vld [vmem:[#allocation2] sm:$0x3] }
  0x22   : > { %v879_v27 = vld [vmem:[%s994_s25 + $0x30] sm:$0xff]   ;;  %v883_v32 = vld [vmem:[%s994_s25 + $0x38] sm:$0xff]   ;;  %v771_v59 = vld [vmem:[%s1077_s2] ss:$0 sm:$0xff] (!%p770_p7) }
  0x23   : > { %781 = vmatpush3.bf16.msra.mxu0 %v863_v11  ;;  %v880_v28 = vld [vmem:[%s994_s25 + $0xb0] sm:$0xff]   ;;  %v884_v33 = vld [vmem:[%s994_s25 + $0xb8] sm:$0xff]   ;;  %v338_v41 = vrot.slane %v324_v38, %v330_v40  ;;  %v339_v44 = vcombine.high %v331_v42, %v331_v42 }
  0x24   : > { %803 = vmatpush3.bf16.msra.mxu1 %v864_v12  ;;  %782 = vmatprep.subr.bf16.mxu0 %v865_v13 }
  0x25   : > { %804 = vmatprep.subr.bf16.mxu1 %v866_v14  ;;  %569 = vmatprep.mubr.bf16.mxu0 %v338_v41  ;;  %v340_v43 = vcombine.high %v338_v41, %v338_v41 }
  0x27   : > { %783 = vmatpush3.bf16.msra.mxu0 %v867_v15  ;;  %609 = vmatprep.mubr.bf16.mxu1 %v340_v43 }
  0x28   : > { %805 = vmatpush3.bf16.msra.mxu1 %v868_v16  ;;  %784 = vmatprep.subr.bf16.mxu0 %v869_v17 }
  0x29   : > { %806 = vmatprep.subr.bf16.mxu1 %v870_v18 }
  0x2b   : > { %785 = vmatpush3.bf16.msra.mxu0 %v871_v19 }
  0x2c   : > { %807 = vmatpush3.bf16.msra.mxu1 %v872_v20  ;;  %786 = vmatprep.subr.bf16.mxu0 %v873_v21 }
  0x2d   : > { %808 = vmatprep.subr.bf16.mxu1 %v874_v22 }
  0x2f   : > { %787 = vmatpush3.bf16.msra.mxu0 %v875_v23 }
  0x30   : > { %809 = vmatpush3.bf16.msra.mxu1 %v876_v24  ;;  %788 = vmatprep.subr.bf16.mxu0 %v877_v25 }
  0x31   : > { %810 = vmatprep.subr.bf16.mxu1 %v878_v26 }
  0x33   : > { %789 = vmatpush3.bf16.msra.mxu0 %v879_v27 }
  0x34   : > { %811 = vmatpush3.bf16.msra.mxu1 %v880_v28  ;;  %790 = vmatprep.subr.bf16.mxu0 %v881_v29 }
  0x35   : > { %812 = vmatprep.subr.bf16.mxu1 %v882_v30 }
  0x37   : > { %791 = vmatpush3.bf16.msra.mxu0 %v883_v32 }
  0x38   : > { %813 = vmatpush3.bf16.msra.mxu1 %v884_v33 }
  0x3a   : > { %570 = vmatmul.mubr.bf16.vlgmr.msra.gmra.mrb[0].mxu0 %v331_v42 }
  0x3b   : > { %610 = vmatmul.mubr.bf16.vlgmr.msra.gmra.mrb[0].mxu1 %v339_v44 }
 0x10d   : > { %v792_v45 = vpop.f32.mrb[0].mxu0 }
 0x10e   : > { %v793_v46 = vpop.f32.mrb[1].mxu0  ;;  %v814_v47 = vpop.f32.mrb[0].mxu1 }
 0x10f   : > { %v794_v48 = vadd.f32 %v793_v46, %v792_v45  ;;  %v795_v49 = vpop.f32.mrb[2].mxu0  ;;  %v815_v50 = vpop.f32.mrb[1].mxu1 }
 0x110   : > { %v796_v51 = vpop.f32.mrb[3].mxu0  ;;  %v816_v52 = vadd.f32 %v815_v50, %v814_v47  ;;  %v817_v53 = vpop.f32.mrb[2].mxu1  ;;  %623 = sbr.rel (%p770_p7) target bundleno = 289 (0x121), region = 40 }
 0x111   : > { %v818_v55 = vpop.f32.mrb[3].mxu1 }
 0x112   : > { %v612_v56 = vadd.f32 %v816_v52, %v794_v48 }
 0x114   : > { %v617_v57 = vadd.f32 %v612_v56, %v250_v54 }
 0x116   : > { %619 = vst.msk [vmem:[#allocation2] sm:$0x3] %vm618_vm1, %v617_v57 }
 0x11d   : > { %v624_v58 = vld [vmem:[#allocation2] sm:$0x3] }
 0x11e   : > { %v632_v60 = vadd.f32 %v771_v59, %v624_v58 }
 0x120   : > { %633 = vst.msk [vmem:[#allocation3] sm:$0x3] %vm618_vm1, %v632_v60 }
 0x121 PF: > { %p1040_p8 = scmp.eq.s32.totalorder %s728_s15, 3  ;;  %s941_s4 = smov [#allocation3]  }
 0x122   : > { %s644_s5 = sshll.u32 %s941_s4, 4  ;;  %s645_s5 = int_to_ptr.vmem [resolvable:$true] %s644_s5 }
 0x123   : > { %s885_s6 = scalar_lea.vmem %s645_s5, 32  ;;  %p892_p12 = scmp.lt.s32.totalorder %s645_s5, %s645_s5 }
 0x124   : > { %p886_p9 = scmp.ne.s32.totalorder %s645_s5, %s885_s6  ;;  %p893_p13 = scmp.lt.s32.totalorder %s885_s6, %s885_s6 }
 0x126   : > { %p887_p10 = pnand %p886_p9, %p1040_p8  ;;  %p894_p0 = por %p893_p13, %p892_p12 }
 0x128   : > { %p888_p11 = pneg %p887_p10 }
 0x12a   : > { %p895_p1 = pnand %p894_p0, %p888_p11 }
 0x12c   : > { %898 = shalt.err (!%p895_p1)
}
 0x12d   : > { %s899_s9 = scalar_lea.hbm %s1078_s3, 32 }
 0x12e   : > { %p900_p2 = scmp.ne.s32.totalorder %s1078_s3, %s899_s9  ;;  %p905_p5 = scmp.lt.u32.totalorder %s899_s9, %s1078_s3 }
 0x130   : > { %p901_p3 = pnand %p900_p2, %p1040_p8 }
 0x132   : > { %p902_p4 = pneg %p901_p3 }
 0x134   : > { %p907_p6 = pnand %p905_p5, %p902_p4 }
 0x136   : > { %910 = shalt.err (!%p907_p6)
}
 0x137   : > { %821 = dma.vmem_to_hbm [thread:$0]  (%p1040_p8), %s645_s5, 32, %s1078_s3, [#allocation4]  }
 0x138   : > { %924 = dma.done.wait (%p1040_p8), [#allocation4], 32  }
 0x139   : > { %926 = vsyncadd (%p1040_p8), [#allocation4], 4294967264 }
 0x13a PF: > { %s14_s14 = sadd.s32 1, %s937_s14   ;;  %s1080_s12 = smov %s933_s13 }
 0x13b   : > { %p11_p7 = scmp.ge.s32.totalorder %s14_s14, 6   ;;  %s1081_s13 = smov %s1083_s16 }
 0x13d   :  { %13 = sbr.rel (!%p11_p7) target bundleno = 2 (0x2), region = 74 }
 0x144   :  { %657 = vsyncpa [#allocation4], 1 }
 0x145   :  { %659 = vsyncpa [#allocation4 + $0x1], 1 }

</bundles_post_ra>
